<compile_context>
chip_gen: v6e
topology: v6e:2x2x1
jax: 0.10.0
libtpu: 0.0.40
codegen_flags: <defaults>
</compile_context>

<pallas_src>
import jax
import jax.numpy as jnp
from jax.experimental import pallas as pl
from jax.experimental.pallas import tpu as pltpu


def _round_up(n, m):
    return ((n + m - 1) // m) * m


def mlp_softmax_kernel(x_ref, w1_ref, b1_ref, w2_ref, b2_ref, w3_ref, b3_ref, o_ref):
    x = x_ref[...]  # (TB, num_inputs), storage dtype (f32 or bf16)

    # Linear(num_inputs, 5) + ReLU  -- accumulate in f32, elementwise in f32.
    h1 = jnp.dot(x, w1_ref[...], preferred_element_type=jnp.float32) + b1_ref[...]
    h1 = jnp.maximum(h1, 0.0)

    # Linear(5, 20) + ReLU
    h2 = jnp.dot(h1.astype(w2_ref.dtype), w2_ref[...],
                 preferred_element_type=jnp.float32) + b2_ref[...]
    h2 = jnp.maximum(h2, 0.0)

    # Linear(20, num_classes)
    logits = jnp.dot(h2.astype(w3_ref.dtype), w3_ref[...],
                     preferred_element_type=jnp.float32) + b3_ref[...]

    # Dropout(p=0.3): identity in eval mode.

    # Numerically stable softmax over the class axis.  Denominator reciprocal
    # goes to the EUP slot (approx=True) -- effectively free.
    m = jnp.max(logits, axis=1, keepdims=True)
    e = jnp.exp(logits - m)
    probs = e * pl.reciprocal(jnp.sum(e, axis=1, keepdims=True), approx=True)

    o_ref[...] = probs.astype(o_ref.dtype)  # narrow (TB, num_classes) store


def our_module_forward(x, params, *, block_b=2048):
    """x: (B, num_inputs). params: dict of weights (in, out) and biases (1, out)."""
    w1, b1 = params["w1"], params["b1"]
    w2, b2 = params["w2"], params["b2"]
    w3, b3 = params["w3"], params["b3"]
    B, num_inputs = x.shape
    num_classes = w3.shape[1]

    # Batch tile: multiple of 8 (sublane granule), at most block_b rows, and
    # capped at ~B/2 so the grid has >=2 steps when B allows it (lets the
    # "parallel" axis shard across both TensorCores on v7x).
    half = _round_up(max(1, pl.cdiv(B, 2)), 8)
    tb = max(8, min(block_b, half))
    grid = (pl.cdiv(B, tb),)

    resident = lambda shp: pl.BlockSpec(shp, lambda i: (0, 0))  # stays in VMEM

    out = pl.pallas_call(
        mlp_softmax_kernel,
        out_shape=jax.ShapeDtypeStruct((B, num_classes), jnp.float32),
        grid=grid,
        in_specs=[
            pl.BlockSpec((tb, num_inputs), lambda i: (i, 0)),
            resident(w1.shape), resident(b1.shape),
            resident(w2.shape), resident(b2.shape),
            resident(w3.shape), resident(b3.shape),
        ],
        out_specs=pl.BlockSpec((tb, num_classes), lambda i: (i, 0)),
        compiler_params=pltpu.CompilerParams(
            dimension_semantics=("parallel",),
            vmem_limit_bytes=64 << 20),
    )(x, w1, b1, w2, b2, w3, b3)

    return out


def init_params(key, num_inputs, num_classes):
    """Deterministic synthetic init (uniform, torch-Linear-like fan-in scaling)."""
    ks = jax.random.split(key, 6)

    def linear(kw, kb, fan_in, fan_out):
        bound = 1.0 / jnp.sqrt(fan_in)
        w = jax.random.uniform(kw, (fan_in, fan_out), jnp.float32, -bound, bound)
        b = jax.random.uniform(kb, (1, fan_out), jnp.float32, -bound, bound)
        return w, b

    w1, b1 = linear(ks[0], ks[1], num_inputs, 5)
    w2, b2 = linear(ks[2], ks[3], 5, 20)
    w3, b3 = linear(ks[4], ks[5], 20, num_classes)
    return {"w1": w1, "b1": b1, "w2": w2, "b2": b2, "w3": w3, "b3": b3}


if __name__ == "__main__":
    key = jax.random.PRNGKey(0)
    k_x, k_p = jax.random.split(key)

    batch = 2
    num_inputs = 32
    num_classes = 10

    x = jax.random.normal(k_x, (batch, num_inputs), jnp.float32)
    params = init_params(k_p, num_inputs, num_classes)

    # f32 path.
    out = jax.block_until_ready(our_module_forward(x, params))

    # Reference (eval-mode forward) in plain JAX.
    h1 = jnp.maximum(x @ params["w1"] + params["b1"], 0.0)
    h2 = jnp.maximum(h1 @ params["w2"] + params["b2"], 0.0)
    logits = h2 @ params["w3"] + params["b3"]
    ref = jax.nn.softmax(logits, axis=1)

    assert out.shape == (batch, num_classes)
    # Tolerance accounts for the EUP approximate reciprocal (~12-bit accurate).
    assert jnp.allclose(out, ref, atol=1e-3, rtol=1e-3)
    assert jnp.allclose(jnp.sum(out, axis=1), 1.0, atol=1e-3)

    # Optional bf16-storage path (halves HBM traffic on the mem-bound input
    # stream); matmul accumulation and softmax stay f32, so only a looser
    # tolerance is needed.
    params_bf16 = jax.tree.map(lambda p: p.astype(jnp.bfloat16), params)
    out_bf16 = jax.block_until_ready(
        our_module_forward(x.astype(jnp.bfloat16), params_bf16))
    assert out_bf16.shape == (batch, num_classes)
    assert jnp.allclose(out_bf16, ref, atol=3e-2, rtol=3e-2)
    assert jnp.allclose(jnp.sum(out_bf16, axis=1), 1.0, atol=3e-3)

    # Larger-batch sanity check (multi-step grid, partial last block).
    xb = jax.random.normal(k_x, (1000, num_inputs), jnp.float32)
    outb = jax.block_until_ready(our_module_forward(xb, params, block_b=256))
    refb = jax.nn.softmax(
        jnp.maximum(jnp.maximum(xb @ params["w1"] + params["b1"], 0.0)
                    @ params["w2"] + params["b2"], 0.0)
        @ params["w3"] + params["b3"], axis=1)
    assert outb.shape == (1000, num_classes)
    assert jnp.allclose(outb, refb, atol=1e-3, rtol=1e-3)

    print("KERNEL_OK")
</pallas_src>

<mosaic_0001>
module attributes {stable_mosaic.version = 11 : i64} {
  func.func @mlp_softmax_kernel(%arg0: i32, %arg1: memref<8x32xf32, #tpu.memory_space<vmem>>, %arg2: memref<32x5xf32, #tpu.memory_space<vmem>>, %arg3: memref<1x5xf32, #tpu.memory_space<vmem>>, %arg4: memref<5x20xf32, #tpu.memory_space<vmem>>, %arg5: memref<1x20xf32, #tpu.memory_space<vmem>>, %arg6: memref<20x10xf32, #tpu.memory_space<vmem>>, %arg7: memref<1x10xf32, #tpu.memory_space<vmem>>, %arg8: memref<8x10xf32, #tpu.memory_space<vmem>>) attributes {dimension_semantics = [#tpu.dimension_semantics<parallel>], iteration_bounds = array<i64: 1>, scalar_prefetch = 0 : i64, scratch_operands = 0 : i64, tpu.core_type = #tpu.core_type<tc>, window_params = [{transform_indices = @transform_0, window_bounds = array<i64: 8, 32>}, {pipeline_mode = #tpu.pipeline_mode<synchronous>, transform_indices = @transform_1, window_bounds = array<i64: 32, 5>}, {pipeline_mode = #tpu.pipeline_mode<synchronous>, transform_indices = @transform_2, window_bounds = array<i64: 1, 5>}, {pipeline_mode = #tpu.pipeline_mode<synchronous>, transform_indices = @transform_3, window_bounds = array<i64: 5, 20>}, {pipeline_mode = #tpu.pipeline_mode<synchronous>, transform_indices = @transform_4, window_bounds = array<i64: 1, 20>}, {pipeline_mode = #tpu.pipeline_mode<synchronous>, transform_indices = @transform_5, window_bounds = array<i64: 20, 10>}, {pipeline_mode = #tpu.pipeline_mode<synchronous>, transform_indices = @transform_6, window_bounds = array<i64: 1, 10>}, {transform_indices = @transform_7, window_bounds = array<i64: 8, 10>}]} {
    %c0 = arith.constant 0 : index
    %c0_0 = arith.constant 0 : index
    %0 = vector.load %arg1[%c0, %c0_0] : memref<8x32xf32, #tpu.memory_space<vmem>>, vector<8x32xf32>
    %c0_1 = arith.constant 0 : index
    %c0_2 = arith.constant 0 : index
    %1 = vector.load %arg2[%c0_1, %c0_2] : memref<32x5xf32, #tpu.memory_space<vmem>>, vector<32x5xf32>
    %cst = arith.constant dense<0.000000e+00> : vector<8x5xf32>
    %2 = tpu.matmul %0, %1, %cst {dimension_numbers = #tpu.dot_dimension_numbers<[1], [0], [0], [1], [0, 0, 1, 1], [], []>} : vector<8x32xf32>, vector<32x5xf32>, vector<8x5xf32> -> vector<8x5xf32>
    %c0_3 = arith.constant 0 : index
    %c0_4 = arith.constant 0 : index
    %3 = vector.load %arg3[%c0_3, %c0_4] : memref<1x5xf32, #tpu.memory_space<vmem>>, vector<1x5xf32>
    %4 = vector.broadcast %3 : vector<1x5xf32> to vector<8x5xf32>
    %5 = arith.addf %2, %4 : vector<8x5xf32>
    %cst_5 = arith.constant 0.000000e+00 : f32
    %6 = vector.broadcast %cst_5 : f32 to vector<8x5xf32>
    %7 = arith.maximumf %5, %6 : vector<8x5xf32>
    %c0_6 = arith.constant 0 : index
    %c0_7 = arith.constant 0 : index
    %8 = vector.load %arg4[%c0_6, %c0_7] : memref<5x20xf32, #tpu.memory_space<vmem>>, vector<5x20xf32>
    %cst_8 = arith.constant dense<0.000000e+00> : vector<8x20xf32>
    %9 = tpu.matmul %7, %8, %cst_8 {dimension_numbers = #tpu.dot_dimension_numbers<[1], [0], [0], [1], [0, 0, 1, 1], [], []>} : vector<8x5xf32>, vector<5x20xf32>, vector<8x20xf32> -> vector<8x20xf32>
    %c0_9 = arith.constant 0 : index
    %c0_10 = arith.constant 0 : index
    %10 = vector.load %arg5[%c0_9, %c0_10] : memref<1x20xf32, #tpu.memory_space<vmem>>, vector<1x20xf32>
    %11 = vector.broadcast %10 : vector<1x20xf32> to vector<8x20xf32>
    %12 = arith.addf %9, %11 : vector<8x20xf32>
    %cst_11 = arith.constant 0.000000e+00 : f32
    %13 = vector.broadcast %cst_11 : f32 to vector<8x20xf32>
    %14 = arith.maximumf %12, %13 : vector<8x20xf32>
    %c0_12 = arith.constant 0 : index
    %c0_13 = arith.constant 0 : index
    %15 = vector.load %arg6[%c0_12, %c0_13] : memref<20x10xf32, #tpu.memory_space<vmem>>, vector<20x10xf32>
    %cst_14 = arith.constant dense<0.000000e+00> : vector<8x10xf32>
    %16 = tpu.matmul %14, %15, %cst_14 {dimension_numbers = #tpu.dot_dimension_numbers<[1], [0], [0], [1], [0, 0, 1, 1], [], []>} : vector<8x20xf32>, vector<20x10xf32>, vector<8x10xf32> -> vector<8x10xf32>
    %c0_15 = arith.constant 0 : index
    %c0_16 = arith.constant 0 : index
    %17 = vector.load %arg7[%c0_15, %c0_16] : memref<1x10xf32, #tpu.memory_space<vmem>>, vector<1x10xf32>
    %18 = vector.broadcast %17 : vector<1x10xf32> to vector<8x10xf32>
    %19 = arith.addf %16, %18 : vector<8x10xf32>
    %cst_17 = arith.constant dense<0xFF800000> : vector<8xf32>
    %20 = vector.multi_reduction <maximumf>, %19, %cst_17 [1] : vector<8x10xf32> to vector<8xf32>
    %21 = vector.shape_cast %20 : vector<8xf32> to vector<8x1xf32>
    %22 = vector.broadcast %21 : vector<8x1xf32> to vector<8x10xf32>
    %23 = arith.subf %19, %22 : vector<8x10xf32>
    %24 = math.exp %23 : vector<8x10xf32>
    %cst_18 = arith.constant dense<0.000000e+00> : vector<8xf32>
    %25 = vector.multi_reduction <add>, %24, %cst_18 [1] : vector<8x10xf32> to vector<8xf32>
    %26 = vector.shape_cast %25 : vector<8xf32> to vector<8x1xf32>
    %27 = tpu.reciprocal %26 {approx = true} : vector<8x1xf32> -> vector<8x1xf32>
    %28 = vector.broadcast %27 : vector<8x1xf32> to vector<8x10xf32>
    %29 = arith.mulf %24, %28 : vector<8x10xf32>
    %c0_19 = arith.constant 0 : index
    %c0_20 = arith.constant 0 : index
    %30 = vector.load %arg8[%c0_19, %c0_20] : memref<8x10xf32, #tpu.memory_space<vmem>>, vector<8x10xf32>
    tpu.vector_store %arg8[%c0_19, %c0_20], %29 {strides = array<i32>} : memref<8x10xf32, #tpu.memory_space<vmem>>, vector<8x10xf32>,
    return
  }
  func.func @transform_0(%arg0: i32) -> (i32, i32) {
    %c0_i32 = arith.constant 0 : i32
    %c0_i32_0 = arith.constant 0 : i32
    return %arg0, %c0_i32 : i32, i32
  }
  func.func @transform_1(%arg0: i32) -> (i32, i32) {
    %c0_i32 = arith.constant 0 : i32
    %c0_i32_0 = arith.constant 0 : i32
    %c0_i32_1 = arith.constant 0 : i32
    return %c0_i32, %c0_i32_0 : i32, i32
  }
  func.func @transform_2(%arg0: i32) -> (i32, i32) {
    %c0_i32 = arith.constant 0 : i32
    %c0_i32_0 = arith.constant 0 : i32
    %c0_i32_1 = arith.constant 0 : i32
    return %c0_i32, %c0_i32_0 : i32, i32
  }
  func.func @transform_3(%arg0: i32) -> (i32, i32) {
    %c0_i32 = arith.constant 0 : i32
    %c0_i32_0 = arith.constant 0 : i32
    %c0_i32_1 = arith.constant 0 : i32
    return %c0_i32, %c0_i32_0 : i32, i32
  }
  func.func @transform_4(%arg0: i32) -> (i32, i32) {
    %c0_i32 = arith.constant 0 : i32
    %c0_i32_0 = arith.constant 0 : i32
    %c0_i32_1 = arith.constant 0 : i32
    return %c0_i32, %c0_i32_0 : i32, i32
  }
  func.func @transform_5(%arg0: i32) -> (i32, i32) {
    %c0_i32 = arith.constant 0 : i32
    %c0_i32_0 = arith.constant 0 : i32
    %c0_i32_1 = arith.constant 0 : i32
    return %c0_i32, %c0_i32_0 : i32, i32
  }
  func.func @transform_6(%arg0: i32) -> (i32, i32) {
    %c0_i32 = arith.constant 0 : i32
    %c0_i32_0 = arith.constant 0 : i32
    %c0_i32_1 = arith.constant 0 : i32
    return %c0_i32, %c0_i32_0 : i32, i32
  }
  func.func @transform_7(%arg0: i32) -> (i32, i32) {
    %c0_i32 = arith.constant 0 : i32
    %c0_i32_0 = arith.constant 0 : i32
    return %arg0, %c0_i32 : i32, i32
  }
}

</mosaic_0001>

<bundles_post_ra>
// kernel: tpu_custom_call.1
= control target key start
LH: loop header
LB: loop body
LE: loop exit
PB: predicated region body
PF: predicated region fallthrough
CT: control target
= control target key end

     0   :  { %12 = vsyncpa [#allocation3], 0  ;;  %v393_v1 = vmov 0.0   ;;  %vm394_vm0 = vmmov 0   ;;  %vm39_vm1 = vcmask 261120   ;;  %vm126_vm2 = vcmask 1044480   ;;  %s483_s0 = inlined_call_operand.vmem [shape: f32[2,32], index: 0, kind: input, shape index: {}]   ;;  %s484_s1 = inlined_call_operand.vmem [shape: f32[32,5], index: 1, kind: input, shape index: {}]   ;;  %s485_s2 = inlined_call_operand.vmem [shape: f32[1,5], index: 2, kind: input, shape index: {}]   ;;  %s486_s3 = inlined_call_operand.vmem [shape: f32[5,20], index: 3, kind: input, shape index: {}]   ;;  %s487_s4 = inlined_call_operand.vmem [shape: f32[1,20], index: 4, kind: input, shape index: {}]   ;;  %s488_s5 = inlined_call_operand.vmem [shape: f32[20,10], index: 5, kind: input, shape index: {}]   ;;  %s489_s6 = inlined_call_operand.vmem [shape: f32[1,10], index: 6, kind: input, shape index: {}]   ;;  %s490_s7 = inlined_call_operand.hbm [shape: f32[2,10], index: 7, kind: output, shape index: {}]  }
   0x1   :  { %v31_v0 = vld [vmem:[%s484_s1 + $0x18] sm:$0xff]  ;;  %337 = vmatprep.subr.mxu0 %v393_v1  ;;  %v30_v2 = vld [vmem:[%s484_s1 + $0x10] sm:$0xff]  ;;  %345 = vmatprep.mubr.msk.f32.mxu0 %vm394_vm0, %v393_v1  ;;  %v29_v3 = vld [vmem:[%s484_s1 + $0x8] sm:$0xff]  ;;  %vm122_vm3 = vcmask 39936   ;;  %vm215_vm4 = vcmask 1043456   ;;  %vm211_vm5 = vcmask 162816  }
   0x2   :  { %338 = vmatpush3.msra.mxu0 %v31_v0  ;;  %348 = vmatprep.subr.mxu1 %v393_v1  ;;  %v28_v4 = vld [vmem:[%s484_s1] sm:$0xff]  ;;  %v203_v12 = vld [vmem:[%s488_s5 + $0x10] sm:$0xf]  ;;  %v202_v13 = vld [vmem:[%s488_s5 + $0x8] sm:$0xff]  ;;  %vm289_vm6 = vcmask 80896  }
   0x3   :  { %339 = vmatprep.subr.mxu0 %v393_v1  ;;  %350 = vmatprep.mubr.msk.f32.mxu1 %vm394_vm0, %v393_v1  ;;  %v27_v5 = vld [vmem:[%s483_s0] sm:$0xff] }
   0x4   :  { %340 = vmatpush3.msra.mxu0 %v30_v2  ;;  %v114_v6 = vld [vmem:[%s486_s3] sm:$0x1f] }
   0x5   :  { %341 = vmatprep.subr.mxu0 %v393_v1  ;;  %349 = vmatpush3.msk.msra.mxu1 %vm126_vm2, %v114_v6  ;;  %v318_v7 = vld [vmem:[%s485_s2] ss:$0 sm:$0xff] }
   0x6   :  { %342 = vmatpush3.msra.mxu0 %v29_v3  ;;  %353 = vmatprep.subr.mxu1 %v393_v1  ;;  %v201_v14 = vld [vmem:[%s488_s5] sm:$0xff] }
   0x7   :  { %343 = vmatprep.subr.mxu0 %v393_v1  ;;  %v320_v15 = vld [vmem:[%s487_s4] ss:$0 sm:$0xff] }
   0x8   :  { %344 = vmatpush3.msra.mxu0 %v28_v4  ;;  %v323_v20 = vld [vmem:[%s489_s6] ss:$0 sm:$0xff] }
   0x9   :  { %346 = vmatmul.mubr.msk.f32.vlgmr.msra.gmra.mxu0 %vm39_vm1, %v27_v5 }
  0xc9   :  { %v109_v8 = vpop.f32.mrf.mxu0 }
  0xca   :  { %v110_v9 = vadd.f32 %v318_v7, %v109_v8 }
  0xcb   :  { %v347_v10 = vpop.f32.mrf.mxu0 }
  0xcc   :  { %v113_v11 = vmax.f32 %v110_v9, 0.0 }
  0xce   :  { %351 = vmatmul.mubr.msk.f32.vlgmr.msra.gmra.mxu1 %vm122_vm3, %v113_v11 }
  0xcf   :  { %359 = vmatprep.mubr.msk.f32.mxu1 %vm394_vm0, %v393_v1  ;;  %354 = vmatpush3.msk.msra.mxu1 %vm215_vm4, %v203_v12 }
  0xd0   :  { %355 = vmatprep.subr.mxu1 %v393_v1 }
  0xd1   :  { %356 = vmatpush3.msra.mxu1 %v202_v13 }
  0xd2   :  { %357 = vmatprep.subr.mxu1 %v393_v1 }
  0xd3   :  { %358 = vmatpush3.msra.mxu1 %v201_v14 }
 0x18e   :  { %v196_v16 = vpop.f32.mrf.mxu1 }
 0x18f   :  { %v197_v17 = vadd.f32 %v320_v15, %v196_v16 }
 0x190   :  { %v352_v18 = vpop.f32.mrf.mxu1 }
 0x191   :  { %v200_v19 = vmax.f32 %v197_v17, 0.0 }
 0x193   :  { %360 = vmatmul.mubr.msk.f32.vlgmr.msra.gmra.mxu1 %vm211_vm5, %v200_v19 }
 0x253   :  { %v285_v21 = vpop.f32.mrf.mxu1 }
 0x254   :  { %v286_v22 = vadd.f32 %v323_v20, %v285_v21 }
 0x255   :  { %v361_v23 = vpop.f32.mrf.mxu1 }
 0x256   :  { %v290_v24 = vsel %vm289_vm6, %v286_v22, -inf }
 0x257   :  { %291 = vmax.xlane.f32.xlu0 %v290_v24 }
 0x2e0   :  { %v292_v25 = vpop.xlane.xlu0 %291 }
 0x2e1   :  { %v293_v26 = vsub.f32 %v286_v22, %v292_v25 }
 0x2e3   :  { %v294_v27 = vmul.f32 1.442695, %v293_v26 }
 0x2e5   :  { %367 = vpow2.f32 %v294_v27 }
 0x2f2   :  { %v368_v28 = vpop.eup %367 }
 0x2f3   :  { %v296_v29 = vsel %vm289_vm6, %v368_v28, 0.0 }
 0x2f4   :  { %297 = vadd.xlane.f32.xlu0 %v296_v29 }
 0x37d   :  { %v298_v30 = vpop.xlane.xlu0 %297 }
 0x37e   :  { %369 = vrcp.f32 %v298_v30 }
 0x38b   :  { %v370_v31 = vpop.eup %369 }
 0x38c   :  { %v300_v32 = vmul.f32 %v370_v31, %v368_v28 }
 0x38e   :  { %301 = vst.msk [vmem:[#allocation2] sm:$0xff] %vm289_vm6, %v300_v32 }
 0x38f   :  { %306 = vsyncadd [#allocation3], 96  ;;  %s395_s4 = smov [#allocation2]  }
 0x390   :  { %s307_s5 = sshll.u32 %s395_s4, 4  ;;  %s308_s5 = int_to_ptr.vmem [resolvable:$true] %s307_s5 }
 0x391   :  { %s371_s6 = scalar_lea.vmem %s308_s5, 32  ;;  %s375_s21 = scalar_lea.vmem %s308_s5, 128 }
 0x392   :  { %p372_p0 = scmp.ne.s32.totalorder %s308_s5, %s371_s6  ;;  %p376_p1 = scmp.lt.s32.totalorder %s308_s5, %s308_s5 }
 0x393   :  { %p377_p2 = scmp.lt.s32.totalorder %s375_s21, %s371_s6 }
 0x395   :  { %p378_p3 = por %p377_p2, %p376_p1 }
 0x397   :  { %p379_p4 = pnand %p378_p3, %p372_p0 }
 0x399   :  { %382 = shalt.err (!%p379_p4)
}
 0x39a   :  { %s396_s22 = smov 32   ;;  %s397_s23 = smov 2  }
 0x39b   :  { %313 = dma.vmem_to_hbm [thread:$0]  %s308_s5, 32, %s490_s7, [#allocation3], %s396_s22, %s396_s22, %s397_s23  }
 0x39c   :  { %391 = dma.done.wait [#allocation3], 128  }
 0x39d   :  { %392 = vsyncadd [#allocation3], 4294967168 }
 0x39e   :  { %317 = vsyncpa [#allocation3], 1 }

</bundles_post_ra>
